<compile_context>
chip_gen: v7x
topology: tpu7x:2x2x1
jax: 0.10.0
libtpu: 0.0.40
codegen_flags: <defaults>
</compile_context>

<pallas_src>
import functools

import jax
import jax.numpy as jnp
from jax.experimental import pallas as pl
from jax.experimental.pallas import tpu as pltpu

LANE = 128  # lane-dense padding width for the final Dout=1 layer


def _mlp_fused_kernel(*refs, n_layers: int):
    """Entire MLP in one kernel invocation (one batch tile).

    refs = (x_ref, w_aug_0_ref, ..., w_aug_{L-1}_ref, o_ref)

    Weights are pre-transposed and bias-augmented:
      hidden layer i : (Din_i + 1, Dout_i + 1), last row = [b_i, 1],
                       last column = e_last (keeps the ones column alive;
                       ReLU(1) = 1 so it survives the activation).
      final layer    : (Din_L + 1, LANE), column 0 = [w_L ; b_L], rest zero.
    The activation stays in registers/VMEM between layers; only the final
    lane-dense (TB, LANE) result is written back.
    """
    x_ref = refs[0]
    o_ref = refs[-1]
    w_refs = refs[1:1 + n_layers]

    x = x_ref[...]
    # Append the ones column once; bias adds are then part of the matmuls.
    h = jnp.concatenate([x, jnp.ones_like(x[:, :1])], axis=-1)
    for i in range(n_layers):
        # MXU matmul with f32 accumulation.  At real sizes, cast h and the
        # weight tile to bfloat16 here (keep preferred_element_type=f32).
        h = jnp.dot(h, w_refs[i][...], preferred_element_type=jnp.float32)
        if i < n_layers - 1:
            h = jnp.maximum(h, 0.0)  # ReLU (trailing ones column stays 1)
    o_ref[...] = h.astype(o_ref.dtype)


def init_mlp_params(key, number_of_hidden_layers: int, input_size: int, hidden_size: int):
    """Mirror MLP.__init__ + MLP.initialize():
       weights ~ N(0,1) in PyTorch (out, in) layout, biases filled with 0.01."""
    assert number_of_hidden_layers >= 0
    dims_in = [input_size] + [hidden_size] * number_of_hidden_layers
    dims_out = [hidden_size] * number_of_hidden_layers + [1]
    params = []
    for i in range(number_of_hidden_layers + 1):
        key, wk = jax.random.split(key)
        w = jax.random.normal(wk, (dims_out[i], dims_in[i]), dtype=jnp.float32)  # (out, in)
        b = jnp.full((dims_out[i],), 0.01, dtype=jnp.float32)
        params.append((w, b))
    return params


def prepare_mlp_params(params):
    """One-time prep (NOT per forward): pre-transpose each weight to (in, out),
    fold its bias in as an extra row, add the ones-propagating column for
    hidden layers, and pad the final Dout=1 layer to LANE columns.

    Returns a list of augmented weights [W_aug_0, ..., W_aug_{L-1}] ready for
    the fused kernel (bias inputs eliminated)."""
    n_layers = len(params)
    aug = []
    for i, (w, b) in enumerate(params):
        w_t = jnp.asarray(w).T                      # (in, out)
        b_row = jnp.asarray(b).reshape(1, -1)       # (1, out)
        din = w_t.shape[0]
        if i < n_layers - 1:
            # [[ W^T , 0 ],
            #  [  b  , 1 ]]  -> (in+1, out+1); preserves the ones column.
            top = jnp.concatenate([w_t, jnp.zeros((din, 1), w_t.dtype)], axis=1)
            bot = jnp.concatenate([b_row, jnp.ones((1, 1), w_t.dtype)], axis=1)
            w_aug = jnp.concatenate([top, bot], axis=0)
        else:
            # Final layer (out == 1): column 0 = [W^T ; b], padded to LANE.
            col = jnp.concatenate([w_t, b_row], axis=0)       # (in+1, 1)
            w_aug = jnp.pad(col, ((0, 0), (0, LANE - col.shape[1])))
        aug.append(w_aug)
    return aug


def mlp_forward(x, aug_weights, block_b=None):
    """Fused forward: one pallas_call for the whole MLP. Returns (B, 1).

    block_b=None (or B <= block_b): single grid point, everything VMEM
    resident, one set of input DMAs.  Otherwise: 1-D grid over the batch with
    the weights VMEM-resident (constant index_map) and the batch axis marked
    "parallel" for megacore sharding."""
    n_layers = len(aug_weights)
    B, din = x.shape
    kernel = functools.partial(_mlp_fused_kernel, n_layers=n_layers)

    if block_b is None or B <= block_b:
        in_specs = [pl.BlockSpec(memory_space=pltpu.MemorySpace.VMEM)
                    for _ in range(1 + n_layers)]
        out_padded = pl.pallas_call(
            kernel,
            out_shape=jax.ShapeDtypeStruct((B, LANE), x.dtype),
            in_specs=in_specs,
            out_specs=pl.BlockSpec(memory_space=pltpu.MemorySpace.VMEM),
        )(x, *aug_weights)
    else:
        assert B % block_b == 0, "pad the batch to a multiple of block_b"
        grid = (B // block_b,)
        in_specs = [pl.BlockSpec((block_b, din), lambda i: (i, 0))]
        for w in aug_weights:
            # Constant index_map -> weight stays VMEM-resident across batch
            # tiles (no re-DMA).  At large hidden sizes consider
            # pipeline_mode=pl.Buffered(1) so it's only charged once vs VMEM.
            in_specs.append(pl.BlockSpec(w.shape, lambda i: (0, 0)))
        out_padded = pl.pallas_call(
            kernel,
            out_shape=jax.ShapeDtypeStruct((B, LANE), x.dtype),
            grid=grid,
            in_specs=in_specs,
            out_specs=pl.BlockSpec((block_b, LANE), lambda i: (i, 0)),
            compiler_params=pltpu.CompilerParams(
                dimension_semantics=("parallel",)),
        )(x, *aug_weights)

    # Only column 0 carries the real Dout=1 output; at large B prefer to let
    # downstream consume the padded (B, LANE) buffer and slice once at the end.
    return out_padded[:, :1]


if __name__ == "__main__":
    key = jax.random.PRNGKey(0)
    key, xk = jax.random.split(key)

    number_of_hidden_layers = 2
    input_size = 16
    hidden_size = 32
    batch = 8

    x = jax.random.normal(xk, (batch, input_size), dtype=jnp.float32)
    params = init_mlp_params(key, number_of_hidden_layers, input_size, hidden_size)
    aug_weights = prepare_mlp_params(params)   # one-time prep (transpose + fold bias + pad)

    # Pure-JAX reference (same params, same math, PyTorch layout).
    def ref_forward(inp):
        h = inp
        for i, (w, b) in enumerate(params):
            h = h @ w.T + b
            if i < len(params) - 1:
                h = jnp.maximum(h, 0.0)
        return h

    # 1) Fused single-call path (toy batch).
    out = jax.block_until_ready(mlp_forward(x, aug_weights))
    assert out.shape == (batch, 1)
    assert jnp.allclose(out, ref_forward(x), atol=1e-5, rtol=1e-5)

    # 2) Batch-grid scaling path: resident weights + "parallel" batch axis.
    big_batch = 256
    key, xk2 = jax.random.split(key)
    xb = jax.random.normal(xk2, (big_batch, input_size), dtype=jnp.float32)
    out_b = jax.block_until_ready(mlp_forward(xb, aug_weights, block_b=128))
    assert out_b.shape == (big_batch, 1)
    assert jnp.allclose(out_b, ref_forward(xb), atol=1e-4, rtol=1e-5)

    print("KERNEL_OK")
</pallas_src>

<mosaic_0001>
module attributes {stable_mosaic.version = 11 : i64} {
  func.func @_mlp_fused_kernel(%arg0: memref<8x16xf32, #tpu.memory_space<vmem>>, %arg1: memref<17x33xf32, #tpu.memory_space<vmem>>, %arg2: memref<33x33xf32, #tpu.memory_space<vmem>>, %arg3: memref<33x128xf32, #tpu.memory_space<vmem>>, %arg4: memref<8x128xf32, #tpu.memory_space<vmem>>) attributes {dimension_semantics = [], scalar_prefetch = 0 : i64, scratch_operands = 0 : i64, tpu.core_type = #tpu.core_type<tc>} {
    %c0 = arith.constant 0 : index
    %c0_0 = arith.constant 0 : index
    %0 = vector.load %arg0[%c0, %c0_0] : memref<8x16xf32, #tpu.memory_space<vmem>>, vector<8x16xf32>
    %cst = arith.constant 1.000000e+00 : f32
    %1 = vector.broadcast %cst : f32 to vector<8x1xf32>
    %2 = tpu.concatenate %0, %1 in 1 : vector<8x16xf32>, vector<8x1xf32> -> vector<8x17xf32>
    %c0_1 = arith.constant 0 : index
    %c0_2 = arith.constant 0 : index
    %3 = vector.load %arg1[%c0_1, %c0_2] : memref<17x33xf32, #tpu.memory_space<vmem>>, vector<17x33xf32>
    %cst_3 = arith.constant dense<0.000000e+00> : vector<8x33xf32>
    %4 = tpu.matmul %2, %3, %cst_3 {dimension_numbers = #tpu.dot_dimension_numbers<[1], [0], [0], [1], [0, 0, 1, 1], [], []>} : vector<8x17xf32>, vector<17x33xf32>, vector<8x33xf32> -> vector<8x33xf32>
    %cst_4 = arith.constant 0.000000e+00 : f32
    %5 = vector.broadcast %cst_4 : f32 to vector<8x33xf32>
    %6 = arith.maximumf %4, %5 : vector<8x33xf32>
    %c0_5 = arith.constant 0 : index
    %c0_6 = arith.constant 0 : index
    %7 = vector.load %arg2[%c0_5, %c0_6] : memref<33x33xf32, #tpu.memory_space<vmem>>, vector<33x33xf32>
    %cst_7 = arith.constant dense<0.000000e+00> : vector<8x33xf32>
    %8 = tpu.matmul %6, %7, %cst_7 {dimension_numbers = #tpu.dot_dimension_numbers<[1], [0], [0], [1], [0, 0, 1, 1], [], []>} : vector<8x33xf32>, vector<33x33xf32>, vector<8x33xf32> -> vector<8x33xf32>
    %cst_8 = arith.constant 0.000000e+00 : f32
    %9 = vector.broadcast %cst_8 : f32 to vector<8x33xf32>
    %10 = arith.maximumf %8, %9 : vector<8x33xf32>
    %c0_9 = arith.constant 0 : index
    %c0_10 = arith.constant 0 : index
    %11 = vector.load %arg3[%c0_9, %c0_10] : memref<33x128xf32, #tpu.memory_space<vmem>>, vector<33x128xf32>
    %cst_11 = arith.constant dense<0.000000e+00> : vector<8x128xf32>
    %12 = tpu.matmul %10, %11, %cst_11 {dimension_numbers = #tpu.dot_dimension_numbers<[1], [0], [0], [1], [0, 0, 1, 1], [], []>} : vector<8x33xf32>, vector<33x128xf32>, vector<8x128xf32> -> vector<8x128xf32>
    %c0_12 = arith.constant 0 : index
    %c0_13 = arith.constant 0 : index
    %13 = vector.load %arg4[%c0_12, %c0_13] : memref<8x128xf32, #tpu.memory_space<vmem>>, vector<8x128xf32>
    tpu.vector_store %arg4[%c0_12, %c0_13], %12 {strides = array<i32>} : memref<8x128xf32, #tpu.memory_space<vmem>>, vector<8x128xf32>,
    return
  }
}

</mosaic_0001>

<bundles_post_ra>
// kernel: tpu_custom_call.1
= control target key start
LH: loop header
LB: loop body
LE: loop exit
PB: predicated region body
PF: predicated region fallthrough
CT: control target
= control target key end

     0   :  { %9 = vsyncpa [#allocation3], 0  ;;  %s648_s0 = inlined_call_operand.hbm [shape: f32[8,16], index: 0, kind: input, shape index: {}]   ;;  %s649_s1 = inlined_call_operand.hbm [shape: f32[17,33], index: 1, kind: input, shape index: {}]   ;;  %s650_s2 = inlined_call_operand.hbm [shape: f32[33,33], index: 2, kind: input, shape index: {}]   ;;  %s651_s3 = inlined_call_operand.hbm [shape: f32[33,128], index: 3, kind: input, shape index: {}]   ;;  %s652_s4 = inlined_call_operand.hbm [shape: f32[8,128], index: 4, kind: output, shape index: {}]  }
   0x1   :  { %10 = vsyncpa [#allocation6], 0 }
   0x2   :  { %11 = vsyncpa [#allocation9], 0 }
   0x3   :  { %12 = vsyncpa [#allocation4], 0  ;;  %s538_s15 = smov [#allocation5]   ;;  %s420_s19 = scalar_lea.hbm %s649_s1, 384 }
   0x4   :  { %s28_s16 = sshll.u32 %s538_s15, 4  ;;  %p421_p0 = scmp.ne.s32.totalorder %s649_s1, %s420_s19  ;;  %s29_s16 = int_to_ptr.vmem [resolvable:$true] %s28_s16 }
   0x5   :  { %p424_p1 = scmp.lt.u32.totalorder %s420_s19, %s649_s1 }
   0x7   :  { %p426_p2 = pnand %p424_p1, %p421_p0 }
   0x9   :  { %429 = shalt.err (!%p426_p2)
}
   0xa   :  { %s430_s24 = scalar_lea.vmem %s29_s16, 384  ;;  %p435_p4 = scmp.lt.s32.totalorder %s29_s16, %s29_s16 }
   0xb   :  { %p431_p3 = scmp.ne.s32.totalorder %s29_s16, %s430_s24  ;;  %p436_p5 = scmp.lt.s32.totalorder %s430_s24, %s430_s24 }
   0xd   :  { %p437_p6 = por %p436_p5, %p435_p4 }
   0xf   :  { %p438_p7 = pnand %p437_p6, %p431_p3 }
  0x11   :  { %441 = shalt.err (!%p438_p7)
}
  0x12   :  { %s539_s25 = smov 128   ;;  %s540_s26 = smov 8  }
  0x13   :  { %34 = dma.hbm_to_vmem [thread:$0]  %s649_s1, 384, %s29_s16, [#allocation6], %s539_s25, %s539_s25, %s540_s26  }
  0x14   :  { %s541_s29 = smov [#allocation2]   ;;  %s542_s5 = smov [#allocation7]  }
  0x15   :  { %s19_s30 = sshll.u32 %s541_s29, 4  ;;  %s40_s6 = sshll.u32 %s542_s5, 4  ;;  %s20_s30 = int_to_ptr.vmem [resolvable:$true] %s19_s30  ;;  %s41_s6 = int_to_ptr.vmem [resolvable:$true] %s40_s6 }
  0x16   :  { %s442_s9 = scalar_lea.hbm %s648_s0, 128 }
  0x17   :  { %p443_p8 = scmp.ne.s32.totalorder %s648_s0, %s442_s9  ;;  %p446_p9 = scmp.lt.u32.totalorder %s442_s9, %s648_s0 }
  0x19   :  { %p448_p10 = pnand %p446_p9, %p443_p8 }
  0x1b   :  { %451 = shalt.err (!%p448_p10)
}
  0x1c   :  { %s452_s1 = scalar_lea.vmem %s20_s30, 128  ;;  %p457_p12 = scmp.lt.s32.totalorder %s20_s30, %s20_s30 }
  0x1d   :  { %p453_p11 = scmp.ne.s32.totalorder %s20_s30, %s452_s1  ;;  %p458_p13 = scmp.lt.s32.totalorder %s452_s1, %s452_s1 }
  0x1f   :  { %p459_p0 = por %p458_p13, %p457_p12 }
  0x21   :  { %p460_p1 = pnand %p459_p0, %p453_p11 }
  0x23   :  { %463 = shalt.err (!%p460_p1)
}
  0x24   :  { %22 = dma.hbm_to_vmem [thread:$0]  %s648_s0, 128, %s20_s30, [#allocation3]  }
  0x25   :  { %s464_s18 = scalar_lea.hbm %s650_s2, 640 }
  0x26   :  { %p465_p2 = scmp.ne.s32.totalorder %s650_s2, %s464_s18  ;;  %p468_p3 = scmp.lt.u32.totalorder %s464_s18, %s650_s2 }
  0x28   :  { %p470_p4 = pnand %p468_p3, %p465_p2 }
  0x2a   :  { %473 = shalt.err (!%p470_p4)
}
  0x2b   :  { %s474_s23 = scalar_lea.vmem %s41_s6, 640  ;;  %p479_p6 = scmp.lt.s32.totalorder %s41_s6, %s41_s6 }
  0x2c   :  { %p475_p5 = scmp.ne.s32.totalorder %s41_s6, %s474_s23  ;;  %p480_p7 = scmp.lt.s32.totalorder %s474_s23, %s474_s23 }
  0x2e   :  { %p481_p8 = por %p480_p7, %p479_p6 }
  0x30   :  { %p482_p9 = pnand %p481_p8, %p475_p5 }
  0x32   :  { %485 = shalt.err (!%p482_p9)
}
  0x33   :  { %46 = dma.hbm_to_vmem [thread:$0]  %s650_s2, 640, %s41_s6, [#allocation6], %s539_s25, %s539_s25, %s540_s26  }
  0x34   :  { %s543_s27 = smov [#allocation8]   ;;  %s486_s5 = scalar_lea.hbm %s651_s3, 640 }
  0x35   :  { %s52_s28 = sshll.u32 %s543_s27, 4  ;;  %p487_p10 = scmp.ne.s32.totalorder %s651_s3, %s486_s5  ;;  %s53_s28 = int_to_ptr.vmem [resolvable:$true] %s52_s28 }
  0x36   :  { %p490_p11 = scmp.lt.u32.totalorder %s486_s5, %s651_s3 }
  0x38   :  { %p492_p12 = pnand %p490_p11, %p487_p10 }
  0x3a   :  { %495 = shalt.err (!%p492_p12)
}
  0x3b   :  { %s496_s11 = scalar_lea.vmem %s53_s28, 640  ;;  %p501_p0 = scmp.lt.s32.totalorder %s53_s28, %s53_s28 }
  0x3c   :  { %p497_p13 = scmp.ne.s32.totalorder %s53_s28, %s496_s11  ;;  %p502_p1 = scmp.lt.s32.totalorder %s496_s11, %s496_s11 }
  0x3e   :  { %p503_p2 = por %p502_p1, %p501_p0 }
  0x40   :  { %p504_p3 = pnand %p503_p2, %p497_p13 }
  0x42   :  { %507 = shalt.err (!%p504_p3)
}
  0x43   :  { %58 = dma.hbm_to_vmem [thread:$0]  %s651_s3, 640, %s53_s28, [#allocation9], %s539_s25, %s539_s25, %s540_s26  }
  0x44   :  { %530 = dma.done.wait [#allocation3], 128  }
  0x45   :  { %531 = vsyncadd [#allocation3], 4294967168 }
  0x46   :  { %532 = dma.done.wait [#allocation6], 1024  }
  0x47   :  { %533 = vsyncadd [#allocation6], 4294966272 }
  0x48   :  { %534 = dma.done.wait [#allocation9], 640  }
  0x49   :  { %535 = vsyncadd [#allocation9], 4294966656  ;;  %v544_v0 = vmov 0.0|0.0   ;;  %vm545_vm0 = vmmov 0   ;;  %v546_v1 = vmov 0.0   ;;  %v74_v2 = vld [vmem:[#allocation5] sm:$0xff] }
  0x4a   :  { %395 = vmatprep.subr.bf16.mxu0 %v544_v0  ;;  %366 = vmatprep.mubr.msk.f32.mxu0 %vm545_vm0, %v546_v1  ;;  %v75_v3 = vld [vmem:[#allocation5 + $0x8] sm:$0xff]  ;;  %v156_v5 = vld [vmem:[#allocation7] sm:$0xff]  ;;  %v157_v6 = vld [vmem:[#allocation7 + $0x8] sm:$0xff]  ;;  %vm72_vm1 = vcmask 130048   ;;  %vm81_vm2 = vcmask 1040384   ;;  %vm77_vm3 = vcmask 138240  }
  0x4b   :  { %398 = vmatprep.subr.bf16.mxu1 %v544_v0  ;;  %379 = vmatprep.mubr.msk.f32.mxu1 %vm545_vm0, %v546_v1  ;;  %v396_v4 = vpack.c.bf16 %v75_v3, %v74_v2  ;;  %v71_v7 = vld [vmem:[#allocation2] sm:$0xff]  ;;  %v399_v8 = vpack.c.bf16 %v157_v6, %v156_v5  ;;  %v158_v9 = vld [vmem:[#allocation7 + $0x10] sm:$0xff]  ;;  %v159_v10 = vld [vmem:[#allocation7 + $0x18] sm:$0xff]  ;;  %vm161_vm4 = vcmask 269312   ;;  %s547_s3 = smov [#allocation10]  }
  0x4c   :  { %v76_v11 = vld [vmem:[#allocation5 + $0x10] sm:$0x1]  ;;  %v402_v12 = vpack.c.bf16 %v159_v10, %v158_v9  ;;  %v73_v13 = vsel %vm72_vm1, %v71_v7, 1.0  ;;  %v160_v14 = vld [vmem:[#allocation7 + $0x20] sm:$0x1]  ;;  %v239_v15 = vld [vmem:[#allocation8] sm:$0xff] }
  0x4d   :  { %397 = vmatpush3.bf16.msra.mxu0 %v396_v4  ;;  %400 = vmatpush3.bf16.msra.mxu1 %v399_v8  ;;  %v240_v16 = vld [vmem:[#allocation8 + $0x8] sm:$0xff]  ;;  %v241_v17 = vld [vmem:[#allocation8 + $0x10] sm:$0xff]  ;;  %v242_v19 = vld [vmem:[#allocation8 + $0x18] sm:$0xff]  ;;  %s327_s25 = sshll.u32 %s547_s3, 4  ;;  %s328_s25 = int_to_ptr.vmem [resolvable:$true] %s327_s25 }
  0x4e   :  { %364 = vmatprep.subr.mxu0 %v546_v1  ;;  %401 = vmatprep.subr.bf16.mxu1 %v544_v0  ;;  %v405_v18 = vpack.c.bf16 %v240_v16, %v239_v15  ;;  %v408_v20 = vpack.c.bf16 %v242_v19, %v241_v17  ;;  %v243_v24 = vld [vmem:[#allocation8 + $0x20] sm:$0x1]  ;;  %s508_s26 = scalar_lea.vmem %s328_s25, 128  ;;  %p513_p5 = scmp.lt.s32.totalorder %s328_s25, %s328_s25 }
  0x4f   :  { %p509_p4 = scmp.ne.s32.totalorder %s328_s25, %s508_s26  ;;  %p514_p6 = scmp.lt.s32.totalorder %s508_s26, %s508_s26 }
  0x51   :  { %365 = vmatpush3.msk.msra.mxu0 %vm81_vm2, %v76_v11  ;;  %403 = vmatpush3.bf16.msra.mxu1 %v402_v12  ;;  %p515_p7 = por %p514_p6, %p513_p5 }
  0x52   :  { %367 = vmatmul.mubr.msk.f32.vlgmr.msra.gmra.mrb[0].mxu0 %vm77_vm3, %v73_v13  ;;  %377 = vmatprep.subr.mxu1 %v546_v1 }
  0x53   :  { %404 = vmatprep.subr.bf16.mxu0 %v544_v0  ;;  %392 = vmatprep.mubr.msk.f32.mxu0 %vm545_vm0, %v546_v1  ;;  %p516_p8 = pnand %p515_p7, %p509_p4 }
  0x54   :  { %406 = vmatpush3.bf16.msra.mxu0 %v405_v18 }
  0x55   :  { %378 = vmatpush3.msk.msra.mxu1 %vm81_vm2, %v160_v14  ;;  %407 = vmatprep.subr.bf16.mxu0 %v544_v0 }
  0x58   :  { %409 = vmatpush3.bf16.msra.mxu0 %v408_v20 }
  0x59   :  { %390 = vmatprep.subr.mxu0 %v546_v1 }
  0x5c   :  { %391 = vmatpush3.msk.msra.mxu0 %vm81_vm2, %v243_v24 }
 0x125   :  { %v151_v21 = vpop.f32.mrb[0].mxu0 }
 0x126   :  { %v155_v22 = vmax.f32 %v151_v21, 0.0  ;;  %v368_v23 = vpop.f32.mrb[1].mxu0 }
 0x128   :  { %380 = vmatmul.mubr.msk.f32.vlgmr.msra.gmra.mrb[0].mxu1 %vm161_vm4, %v155_v22 }
 0x1fb   :  { %v234_v25 = vpop.f32.mrb[0].mxu1 }
 0x1fc   :  { %v238_v26 = vmax.f32 %v234_v25, 0.0  ;;  %v381_v27 = vpop.f32.mrb[1].mxu1 }
 0x1fe   :  { %393 = vmatmul.mubr.msk.f32.vlgmr.msra.gmra.mrb[2].mxu0 %vm161_vm4, %v238_v26 }
 0x2d1   :  { %v316_v28 = vpop.f32.mrb[2].mxu0 }
 0x2d2   :  { %320 = vst [vmem:[#allocation10] sm:$0xff] %v316_v28  ;;  %v394_v29 = vpop.f32.mrb[3].mxu0 }
 0x2d3   :  { %519 = shalt.err (!%p516_p8)
}
 0x2d4   :  { %s520_s1 = scalar_lea.hbm %s652_s4, 128 }
 0x2d5   :  { %p521_p9 = scmp.ne.s32.totalorder %s652_s4, %s520_s1  ;;  %p524_p10 = scmp.lt.u32.totalorder %s520_s1, %s652_s4 }
 0x2d7   :  { %p526_p11 = pnand %p524_p10, %p521_p9 }
 0x2d9   :  { %529 = shalt.err (!%p526_p11)
}
 0x2da   :  { %330 = dma.vmem_to_hbm [thread:$0]  %s328_s25, 128, %s652_s4, [#allocation4]  }
 0x2db   :  { %536 = dma.done.wait [#allocation4], 128  }
 0x2dc   :  { %537 = vsyncadd [#allocation4], 4294967168 }
 0x2dd   :  { %334 = vsyncpa [#allocation3], 1 }
 0x2de   :  { %335 = vsyncpa [#allocation6], 1 }
 0x2df   :  { %336 = vsyncpa [#allocation9], 1 }
 0x2e0   :  { %337 = vsyncpa [#allocation4], 1 }

</bundles_post_ra>
